<compile_context>
chip_gen: v5e
topology: v5e:2x2
jax: 0.10.0
libtpu: 0.0.40
codegen_flags: <defaults>
</compile_context>

<pallas_src>
import jax
import jax.numpy as jnp
from jax.experimental import pallas as pl
from jax.experimental.pallas import tpu as pltpu

IN_FEATURES = 28 * 28   # 784
HIDDEN = 128
N_CLASSES = 10
OUT_PAD = 128           # logits padded 10 -> 128 lanes for lane-dense stores


def mlp_kernel(x_ref, w1_ref, b1_ref, w2_ref, b2_ref, o_ref):
    # x tile (TM, 784) f32; cast to bf16 right before the MXU (VPU cast is
    # cheap and keeps the matmul at native bf16 rate on all generations).
    x = x_ref[...].astype(jnp.bfloat16)
    h = jnp.dot(x, w1_ref[...], preferred_element_type=jnp.float32)   # MXU, f32 acc
    h = jnp.maximum(h + b1_ref[...], 0.0)                             # f32 bias + ReLU (VPU)
    out = jnp.dot(h.astype(jnp.bfloat16), w2_ref[...],
                  preferred_element_type=jnp.float32)                 # MXU, f32 acc
    o_ref[...] = (out + b2_ref[...]).astype(o_ref.dtype)              # lane-dense bf16 store


def _round_up(n, m):
    return ((n + m - 1) // m) * m


def _choose_tiling(B, tm_max=1024):
    """Pick (batch tile TM, padded batch Bp).

    - tiny batches (<=128): one minimally padded tile.
    - mid batches (<=512): exactly two tiles (one per v7x TensorCore),
      minimally padded to a multiple of 16 sublanes.
    - large batches: tiles are multiples of 256 (full MXU row blocks on
      v6e/v7x), capped at tm_max so double-buffered VMEM stays a few MiB,
      and capped at half the padded batch so the grid has >= 2 parallel steps.
    """
    B = max(int(B), 1)
    if B <= 128:
        TM = _round_up(B, 16)
        return TM, TM
    if B <= 512:
        TM = _round_up(pl.cdiv(B, 2), 16)
        return TM, 2 * TM
    TM = min(tm_max, max(256, (_round_up(B, 256) // 2) // 256 * 256))
    return TM, _round_up(B, TM)


def prepare_params(w1, b1, w2, b2):
    """One-time packing of weights into kernel-ready buffers (hoisted out of
    the per-call path): bf16 matmul operands, fc2 zero-padded to 128 output
    lanes, f32 biases shaped (1, N)."""
    w1_bf = jnp.asarray(w1).astype(jnp.bfloat16)                      # (784, 128)
    b1_f = jnp.asarray(b1, jnp.float32).reshape(1, HIDDEN)            # (1, 128)
    w2_p = jnp.zeros((HIDDEN, OUT_PAD), jnp.bfloat16)
    w2_p = w2_p.at[:, :N_CLASSES].set(jnp.asarray(w2).astype(jnp.bfloat16))
    b2_p = jnp.zeros((1, OUT_PAD), jnp.float32)
    b2_p = b2_p.at[:, :N_CLASSES].set(
        jnp.asarray(b2, jnp.float32).reshape(1, N_CLASSES))
    return w1_bf, b1_f, w2_p, b2_p


def neural_net_forward(x_nchw, params, *, tm_max=1024):
    """x_nchw: (B, 1, 28, 28) float32 (any shape flattening to 784 features).
    params: output of prepare_params(). Returns logits (B, 10) float32."""
    w1_bf, b1_f, w2_p, b2_p = params
    x = x_nchw.reshape(-1, IN_FEATURES).astype(jnp.float32)   # == torch .view(-1, 784)
    B = x.shape[0]

    TM, Bp = _choose_tiling(B, tm_max)
    if Bp != B:
        x = jnp.pad(x, ((0, Bp - B), (0, 0)))                 # tail rows only

    grid = (Bp // TM,)

    cost = pl.CostEstimate(
        flops=2 * Bp * (IN_FEATURES * HIDDEN + HIDDEN * OUT_PAD),
        bytes_accessed=(Bp * IN_FEATURES * 4            # x (f32, dominant read)
                        + IN_FEATURES * HIDDEN * 2      # W1 (bf16)
                        + HIDDEN * OUT_PAD * 2          # W2 (bf16)
                        + (HIDDEN + OUT_PAD) * 4        # biases (f32)
                        + Bp * OUT_PAD * 2),            # output (bf16)
        transcendentals=0,
    )

    out = pl.pallas_call(
        mlp_kernel,
        out_shape=jax.ShapeDtypeStruct((Bp, OUT_PAD), jnp.bfloat16),
        grid_spec=pltpu.PrefetchScalarGridSpec(
            num_scalar_prefetch=0,
            grid=grid,
            in_specs=[
                pl.BlockSpec((TM, IN_FEATURES), lambda i: (i, 0)),      # x tile
                pl.BlockSpec((IN_FEATURES, HIDDEN), lambda i: (0, 0)),  # W1 resident
                pl.BlockSpec((1, HIDDEN), lambda i: (0, 0)),            # b1 resident
                pl.BlockSpec((HIDDEN, OUT_PAD), lambda i: (0, 0)),      # W2 resident
                pl.BlockSpec((1, OUT_PAD), lambda i: (0, 0)),           # b2 resident
            ],
            out_specs=pl.BlockSpec((TM, OUT_PAD), lambda i: (i, 0)),
        ),
        compiler_params=pltpu.CompilerParams(
            dimension_semantics=("parallel",)),
        cost_estimate=cost,
    )(x, w1_bf, b1_f, w2_p, b2_p)

    # Padded batch rows (B..Bp) hold garbage logits; slice them off here and
    # never reuse the padded buffer.
    return out[:B, :N_CLASSES].astype(jnp.float32)


def init_params(key):
    """Deterministic parameter init mirroring nn.Linear shapes (stored
    transposed for row-major matmul):
      fc1: weight (784, 128), bias (1, 128)
      fc2: weight (128, 10),  bias (1, 10)
    """
    k1, k2, k3, k4 = jax.random.split(key, 4)
    lim1 = 1.0 / jnp.sqrt(784.0)
    lim2 = 1.0 / jnp.sqrt(128.0)
    w1 = jax.random.uniform(k1, (IN_FEATURES, HIDDEN), jnp.float32, -lim1, lim1)
    b1 = jax.random.uniform(k2, (1, HIDDEN), jnp.float32, -lim1, lim1)
    w2 = jax.random.uniform(k3, (HIDDEN, N_CLASSES), jnp.float32, -lim2, lim2)
    b2 = jax.random.uniform(k4, (1, N_CLASSES), jnp.float32, -lim2, lim2)
    return w1, b1, w2, b2


if __name__ == "__main__":
    key = jax.random.PRNGKey(0)
    kx, kp = jax.random.split(key)

    w1, b1, w2, b2 = init_params(kp)
    params = prepare_params(w1, b1, w2, b2)           # one-time weight packing
    fwd = jax.jit(neural_net_forward)

    def ref_logits(x):
        xf = x.reshape(-1, IN_FEATURES)
        return jnp.maximum(xf @ w1 + b1, 0.0) @ w2 + b2

    # 1) small-batch smoke test (B=2), NCHW input like PyTorch.
    B = 2
    x = jax.random.normal(kx, (B, 1, 28, 28), jnp.float32)
    out = jax.block_until_ready(fwd(x, params))
    ref = ref_logits(x)
    assert out.shape == (B, N_CLASSES)
    assert jnp.allclose(out, ref, atol=5e-2, rtol=5e-2), (
        f"max abs err {jnp.max(jnp.abs(out - ref))}")

    # 2) multi-tile path (grid of 2 parallel steps, tail-row padding).
    B2 = 384
    x2 = jax.random.normal(kx, (B2, 1, 28, 28), jnp.float32)
    out2 = jax.block_until_ready(fwd(x2, params))
    ref2 = ref_logits(x2)
    assert out2.shape == (B2, N_CLASSES)
    assert jnp.allclose(out2, ref2, atol=5e-2, rtol=5e-2), (
        f"max abs err {jnp.max(jnp.abs(out2 - ref2))}")

    print("KERNEL_OK")
</pallas_src>

<mosaic_0001>
module attributes {stable_mosaic.version = 11 : i64} {
  func.func @mlp_kernel(%arg0: i32, %arg1: memref<16x784xf32, #tpu.memory_space<vmem>>, %arg2: memref<784x128xbf16, #tpu.memory_space<vmem>>, %arg3: memref<1x128xf32, #tpu.memory_space<vmem>>, %arg4: memref<128x128xbf16, #tpu.memory_space<vmem>>, %arg5: memref<1x128xf32, #tpu.memory_space<vmem>>, %arg6: memref<16x128xbf16, #tpu.memory_space<vmem>>) attributes {dimension_semantics = [#tpu.dimension_semantics<parallel>], iteration_bounds = array<i64: 1>, scalar_prefetch = 0 : i64, scratch_operands = 0 : i64, tpu.core_type = #tpu.core_type<tc>, window_params = [{transform_indices = @transform_0, window_bounds = array<i64: 16, 784>}, {pipeline_mode = #tpu.pipeline_mode<synchronous>, transform_indices = @transform_1, window_bounds = array<i64: 784, 128>}, {pipeline_mode = #tpu.pipeline_mode<synchronous>, transform_indices = @transform_2, window_bounds = array<i64: 1, 128>}, {pipeline_mode = #tpu.pipeline_mode<synchronous>, transform_indices = @transform_3, window_bounds = array<i64: 128, 128>}, {pipeline_mode = #tpu.pipeline_mode<synchronous>, transform_indices = @transform_4, window_bounds = array<i64: 1, 128>}, {transform_indices = @transform_5, window_bounds = array<i64: 16, 128>}]} {
    %c0 = arith.constant 0 : index
    %c0_0 = arith.constant 0 : index
    %0 = vector.load %arg1[%c0, %c0_0] : memref<16x784xf32, #tpu.memory_space<vmem>>, vector<16x784xf32>
    %1 = arith.truncf %0 : vector<16x784xf32> to vector<16x784xbf16>
    %c0_1 = arith.constant 0 : index
    %c0_2 = arith.constant 0 : index
    %2 = vector.load %arg2[%c0_1, %c0_2] : memref<784x128xbf16, #tpu.memory_space<vmem>>, vector<784x128xbf16>
    %cst = arith.constant dense<0.000000e+00> : vector<16x128xf32>
    %3 = tpu.matmul %1, %2, %cst {dimension_numbers = #tpu.dot_dimension_numbers<[1], [0], [0], [1], [0, 0, 1, 1], [], []>} : vector<16x784xbf16>, vector<784x128xbf16>, vector<16x128xf32> -> vector<16x128xf32>
    %c0_3 = arith.constant 0 : index
    %c0_4 = arith.constant 0 : index
    %4 = vector.load %arg3[%c0_3, %c0_4] : memref<1x128xf32, #tpu.memory_space<vmem>>, vector<1x128xf32>
    %5 = vector.broadcast %4 : vector<1x128xf32> to vector<16x128xf32>
    %6 = arith.addf %3, %5 : vector<16x128xf32>
    %cst_5 = arith.constant 0.000000e+00 : f32
    %7 = vector.broadcast %cst_5 : f32 to vector<16x128xf32>
    %8 = arith.maximumf %6, %7 : vector<16x128xf32>
    %9 = arith.truncf %8 : vector<16x128xf32> to vector<16x128xbf16>
    %c0_6 = arith.constant 0 : index
    %c0_7 = arith.constant 0 : index
    %10 = vector.load %arg4[%c0_6, %c0_7] : memref<128x128xbf16, #tpu.memory_space<vmem>>, vector<128x128xbf16>
    %cst_8 = arith.constant dense<0.000000e+00> : vector<16x128xf32>
    %11 = tpu.matmul %9, %10, %cst_8 {dimension_numbers = #tpu.dot_dimension_numbers<[1], [0], [0], [1], [0, 0, 1, 1], [], []>} : vector<16x128xbf16>, vector<128x128xbf16>, vector<16x128xf32> -> vector<16x128xf32>
    %c0_9 = arith.constant 0 : index
    %c0_10 = arith.constant 0 : index
    %12 = vector.load %arg5[%c0_9, %c0_10] : memref<1x128xf32, #tpu.memory_space<vmem>>, vector<1x128xf32>
    %13 = vector.broadcast %12 : vector<1x128xf32> to vector<16x128xf32>
    %14 = arith.addf %11, %13 : vector<16x128xf32>
    %15 = arith.truncf %14 : vector<16x128xf32> to vector<16x128xbf16>
    %c0_11 = arith.constant 0 : index
    %c0_12 = arith.constant 0 : index
    %16 = vector.load %arg6[%c0_11, %c0_12] : memref<16x128xbf16, #tpu.memory_space<vmem>>, vector<16x128xbf16>
    tpu.vector_store %arg6[%c0_11, %c0_12], %15 {strides = array<i32>} : memref<16x128xbf16, #tpu.memory_space<vmem>>, vector<16x128xbf16>,
    return
  }
  func.func @transform_0(%arg0: i32) -> (i32, i32) {
    %c0_i32 = arith.constant 0 : i32
    %c0_i32_0 = arith.constant 0 : i32
    return %arg0, %c0_i32 : i32, i32
  }
  func.func @transform_1(%arg0: i32) -> (i32, i32) {
    %c0_i32 = arith.constant 0 : i32
    %c0_i32_0 = arith.constant 0 : i32
    %c0_i32_1 = arith.constant 0 : i32
    return %c0_i32, %c0_i32_0 : i32, i32
  }
  func.func @transform_2(%arg0: i32) -> (i32, i32) {
    %c0_i32 = arith.constant 0 : i32
    %c0_i32_0 = arith.constant 0 : i32
    %c0_i32_1 = arith.constant 0 : i32
    return %c0_i32, %c0_i32_0 : i32, i32
  }
  func.func @transform_3(%arg0: i32) -> (i32, i32) {
    %c0_i32 = arith.constant 0 : i32
    %c0_i32_0 = arith.constant 0 : i32
    %c0_i32_1 = arith.constant 0 : i32
    return %c0_i32, %c0_i32_0 : i32, i32
  }
  func.func @transform_4(%arg0: i32) -> (i32, i32) {
    %c0_i32 = arith.constant 0 : i32
    %c0_i32_0 = arith.constant 0 : i32
    %c0_i32_1 = arith.constant 0 : i32
    return %c0_i32, %c0_i32_0 : i32, i32
  }
  func.func @transform_5(%arg0: i32) -> (i32, i32) {
    %c0_i32 = arith.constant 0 : i32
    %c0_i32_0 = arith.constant 0 : i32
    return %arg0, %c0_i32 : i32, i32
  }
}

</mosaic_0001>

<bundles_post_ra>
// kernel: neural_net_forward.1
= control target key start
LH: loop header
LB: loop body
LE: loop exit
PB: predicated region body
PF: predicated region fallthrough
CT: control target
= control target key end

     0   :  { %10 = vsyncpa [#allocation3], 0  ;;  %s972_s21 = smov [#allocation2]   ;;  %s973_s23 = smov 64   ;;  %s1083_s0 = inlined_call_operand.vmem [shape: f32[16,784], index: 0, kind: input, shape index: {}]   ;;  %s1084_s1 = inlined_call_operand.hbm [shape: bf16[784,128], index: 1, kind: input, shape index: {}]   ;;  %s1085_s2 = inlined_call_operand.vmem [shape: f32[1,128], index: 2, kind: input, shape index: {}]   ;;  %s1086_s3 = inlined_call_operand.vmem [shape: bf16[128,128], index: 3, kind: input, shape index: {}]   ;;  %s1087_s4 = inlined_call_operand.vmem [shape: f32[1,128], index: 4, kind: input, shape index: {}]   ;;  %s1088_s5 = inlined_call_operand.vmem [shape: bf16[16,128], index: 5, kind: output, shape index: {}]  }
   0x1   :  { %s17_s20 = sshll.u32 %s1084_s1, 4  ;;  %s19_s22 = sshll.u32 %s972_s21, 4  ;;  %s18_s20 = int_to_ptr.hbm [resolvable:$true] %s17_s20  ;;  %s20_s22 = int_to_ptr.vmem [resolvable:$true] %s19_s22 }
   0x2   :  { %s974_s24 = smov 4  }
   0x3   :  { %25 = dma.hbm_to_vmem [thread:$0]  %s18_s20, 6272, %s20_s22, [#allocation3], %s973_s23, %s973_s23, %s974_s24  }
   0x4   :  { %970 = dma.done.wait [#allocation3], 6272  }
   0x5   :  { %971 = vsyncadd [#allocation3], 4294961024  ;;  %v886_v0 = vld [vmem:[#allocation2 + $0x38] sm:$0xff]  ;;  %v885_v4 = vld [vmem:[#allocation2 + $0x30] sm:$0xff]  ;;  %vm454_vm0 = vcmask 130048  }
   0x6   :  { %v894_v1 = vld [vmem:[#allocation2 + $0x78] sm:$0xff]  ;;  %458 = vmatpush.bf16.msra.mxu0 %v886_v0  ;;  %v893_v5 = vld [vmem:[#allocation2 + $0x70] sm:$0xff]  ;;  %v884_v8 = vld [vmem:[#allocation2 + $0x28] sm:$0xff] }
   0x7   :  { %v902_v2 = vld [vmem:[#allocation2 + $0xb8] sm:$0xff]  ;;  %472 = vmatpush.bf16.msra.mxu1 %v894_v1  ;;  %v901_v6 = vld [vmem:[#allocation2 + $0xb0] sm:$0xff]  ;;  %v892_v9 = vld [vmem:[#allocation2 + $0x68] sm:$0xff] }
   0x8   :  { %v910_v3 = vld [vmem:[#allocation2 + $0xf8] sm:$0xff]  ;;  %486 = vmatpush.bf16.msra.mxu2 %v902_v2  ;;  %v909_v7 = vld [vmem:[#allocation2 + $0xf0] sm:$0xff]  ;;  %v900_v10 = vld [vmem:[#allocation2 + $0xa8] sm:$0xff] }
   0x9   :  { %500 = vmatpush.bf16.msra.mxu3 %v910_v3  ;;  %v908_v11 = vld [vmem:[#allocation2 + $0xe8] sm:$0xff]  ;;  %v883_v12 = vld [vmem:[#allocation2 + $0x20] sm:$0xff]  ;;  %v882_v16 = vld [vmem:[#allocation2 + $0x18] sm:$0xff] }
   0xa   :  { %459 = vmatpush.bf16.msra.mxu0 %v885_v4  ;;  %v891_v13 = vld [vmem:[#allocation2 + $0x60] sm:$0xff]  ;;  %v890_v17 = vld [vmem:[#allocation2 + $0x58] sm:$0xff]  ;;  %v881_v20 = vld [vmem:[#allocation2 + $0x10] sm:$0xff] }
   0xb   :  { %473 = vmatpush.bf16.msra.mxu1 %v893_v5  ;;  %v899_v14 = vld [vmem:[#allocation2 + $0xa0] sm:$0xff]  ;;  %v898_v18 = vld [vmem:[#allocation2 + $0x98] sm:$0xff]  ;;  %v889_v21 = vld [vmem:[#allocation2 + $0x50] sm:$0xff] }
   0xc   :  { %487 = vmatpush.bf16.msra.mxu2 %v901_v6  ;;  %v907_v15 = vld [vmem:[#allocation2 + $0xe0] sm:$0xff]  ;;  %v906_v19 = vld [vmem:[#allocation2 + $0xd8] sm:$0xff]  ;;  %v897_v22 = vld [vmem:[#allocation2 + $0x90] sm:$0xff] }
   0xd   :  { %501 = vmatpush.bf16.msra.mxu3 %v909_v7  ;;  %v905_v23 = vld [vmem:[#allocation2 + $0xd0] sm:$0xff]  ;;  %v880_v24 = vld [vmem:[#allocation2 + $0x8] sm:$0xff]  ;;  %v879_v28 = vld [vmem:[#allocation2] sm:$0xff] }
   0xe   :  { %460 = vmatpush.bf16.msra.mxu0 %v884_v8  ;;  %v888_v25 = vld [vmem:[#allocation2 + $0x48] sm:$0xff]  ;;  %v887_v29 = vld [vmem:[#allocation2 + $0x40] sm:$0xff]  ;;  %v44_v31 = vld [vmem:[%s1083_s0 + $0x38] sm:$0xff] }
   0xf   :  { %474 = vmatpush.bf16.msra.mxu1 %v892_v9  ;;  %v896_v26 = vld [vmem:[#allocation2 + $0x88] sm:$0xff]  ;;  %v37_v30 = vld [vmem:[%s1083_s0] sm:$0xff]  ;;  %v918_v34 = vld [vmem:[#allocation2 + $0x138] sm:$0xff] }
  0x10   :  { %488 = vmatpush.bf16.msra.mxu2 %v900_v10  ;;  %v904_v27 = vld [vmem:[#allocation2 + $0xc8] sm:$0xff]  ;;  %v45_v33 = vld [vmem:[%s1083_s0 + $0x40] sm:$0xff]  ;;  %v926_v35 = vld [vmem:[#allocation2 + $0x178] sm:$0xff]  ;;  %v51_v40 = vpack.c.bf16 %v44_v31, %v37_v30 }
  0x11   :  { %502 = vmatpush.bf16.msra.mxu3 %v908_v11  ;;  %v38_v32 = vld [vmem:[%s1083_s0 + $0x8] sm:$0xff]  ;;  %v895_v36 = vld [vmem:[#allocation2 + $0x80] sm:$0xff]  ;;  %v39_v38 = vld [vmem:[%s1083_s0 + $0x10] sm:$0xff] }
  0x12   :  { %461 = vmatpush.bf16.msra.mxu0 %v883_v12  ;;  %v903_v37 = vld [vmem:[#allocation2 + $0xc0] sm:$0xff]  ;;  %v46_v39 = vld [vmem:[%s1083_s0 + $0x48] sm:$0xff]  ;;  %v40_v41 = vld [vmem:[%s1083_s0 + $0x18] sm:$0xff]  ;;  %v52_v43 = vpack.c.bf16 %v45_v33, %v38_v32 }
  0x13   :  { %475 = vmatpush.bf16.msra.mxu1 %v891_v13  ;;  %v47_v42 = vld [vmem:[%s1083_s0 + $0x50] sm:$0xff]  ;;  %v927_v44 = vld [vmem:[#allocation2 + $0x180] sm:$0xff]  ;;  %v53_v47 = vpack.c.bf16 %v46_v39, %v39_v38  ;;  %v916_v49 = vld [vmem:[#allocation2 + $0x128] sm:$0xff] }
  0x14   :  { %489 = vmatpush.bf16.msra.mxu2 %v899_v14  ;;  %v917_v45 = vld [vmem:[#allocation2 + $0x130] sm:$0xff]  ;;  %v54_v48 = vpack.c.bf16 %v47_v42, %v40_v41  ;;  %v924_v50 = vld [vmem:[#allocation2 + $0x168] sm:$0xff]  ;;  %v915_v51 = vld [vmem:[#allocation2 + $0x120] sm:$0xff] }
  0x15   :  { %503 = vmatpush.bf16.msra.mxu3 %v907_v15  ;;  %v925_v46 = vld [vmem:[#allocation2 + $0x170] sm:$0xff]  ;;  %v923_v52 = vld [vmem:[#allocation2 + $0x160] sm:$0xff]  ;;  %v914_v53 = vld [vmem:[#allocation2 + $0x118] sm:$0xff] }
  0x16   :  { %462 = vmatpush.bf16.msra.mxu0 %v882_v16  ;;  %v922_v54 = vld [vmem:[#allocation2 + $0x158] sm:$0xff]  ;;  %v43_v55 = vld [vmem:[%s1083_s0 + $0x30] sm:$0xff]  ;;  %v50_v56 = vld [vmem:[%s1083_s0 + $0x68] sm:$0xff] }
  0x17   :  { %476 = vmatpush.bf16.msra.mxu1 %v890_v17  ;;  %v913_v57 = vld [vmem:[#allocation2 + $0x110] sm:$0xff]  ;;  %v57_v59 = vpack.c.bf16 %v50_v56, %v43_v55  ;;  %v912_v60 = vld [vmem:[#allocation2 + $0x108] sm:$0xff]  ;;  %v911_v62 = vld [vmem:[#allocation2 + $0x100] sm:$0xff] }
  0x18   :  { %490 = vmatpush.bf16.msra.mxu2 %v898_v18  ;;  %v921_v58 = vld [vmem:[#allocation2 + $0x150] sm:$0xff]  ;;  %v920_v61 = vld [vmem:[#allocation2 + $0x148] sm:$0xff]  ;;  %v919_v63 = vld [vmem:[#allocation2 + $0x140] sm:$0xff] }
  0x19   :  { %504 = vmatpush.bf16.msra.mxu3 %v906_v19  ;;  %v41_v0 = vld [vmem:[%s1083_s0 + $0x20] sm:$0xff]  ;;  %v48_v1 = vld [vmem:[%s1083_s0 + $0x58] sm:$0xff]  ;;  %v42_v2 = vld [vmem:[%s1083_s0 + $0x28] sm:$0xff] }
  0x1a   :  { %463 = vmatpush.bf16.msra.mxu0 %v881_v20  ;;  %v49_v3 = vld [vmem:[%s1083_s0 + $0x60] sm:$0xff]  ;;  %v55_v4 = vpack.c.bf16 %v48_v1, %v41_v0  ;;  %v935_v6 = vld [vmem:[%s1086_s3 + $0x38] sm:$0xff]  ;;  %v934_v7 = vld [vmem:[%s1086_s3 + $0x30] sm:$0xff] }
  0x1b   :  { %477 = vmatpush.bf16.msra.mxu1 %v889_v21  ;;  %v56_v5 = vpack.c.bf16 %v49_v3, %v42_v2  ;;  %v933_v8 = vld [vmem:[%s1086_s3 + $0x28] sm:$0xff]  ;;  %v932_v9 = vld [vmem:[%s1086_s3 + $0x20] sm:$0xff]  ;;  %v931_v10 = vld [vmem:[%s1086_s3 + $0x18] sm:$0xff] }
  0x1c   :  { %491 = vmatpush.bf16.msra.mxu2 %v897_v22  ;;  %v930_v11 = vld [vmem:[%s1086_s3 + $0x10] sm:$0xff]  ;;  %v929_v12 = vld [vmem:[%s1086_s3 + $0x8] sm:$0xff]  ;;  %v928_v16 = vld [vmem:[%s1086_s3] sm:$0xff] }
  0x1d   :  { %505 = vmatpush.bf16.msra.mxu3 %v905_v23  ;;  %v944_v17 = vld [vmem:[%s1085_s2] ss:$0 sm:$0xff] }
  0x1e   :  { %464 = vmatpush.bf16.msra.mxu0 %v880_v24 }
  0x1f   :  { %478 = vmatpush.bf16.msra.mxu1 %v888_v25 }
  0x20   :  { %492 = vmatpush.bf16.msra.mxu2 %v896_v26 }
  0x21   :  { %506 = vmatpush.bf16.msra.mxu3 %v904_v27 }
  0x22   :  { %465 = vmatpush.bf16.msra.mxu0 %v879_v28 }
  0x23   :  { %479 = vmatpush.bf16.msra.mxu1 %v887_v29 }
  0x24   :  { %493 = vmatpush.bf16.msra.mxu2 %v895_v36 }
  0x25   :  { %507 = vmatpush.bf16.msra.mxu3 %v903_v37  ;;  %466 = vmatmul.bf16.vlgmr.msra.gmra.mxu0 %v51_v40 }
  0x26   :  { %514 = vmatpush.bf16.msrb.mxu0 %v918_v34  ;;  %480 = vmatmul.bf16.vlgmr.msra.gmra.mxu1 %v52_v43 }
  0x27   :  { %528 = vmatpush.bf16.msrb.mxu1 %v926_v35  ;;  %494 = vmatmul.bf16.vlgmr.msra.gmra.mxu2 %v53_v47  ;;  %v945_v47 = vld [vmem:[%s1087_s4] ss:$0 sm:$0xff] }
  0x28   :  { %549 = vmatpush.bf16.msrb.mxu2 %v927_v44  ;;  %508 = vmatmul.bf16.vlgmr.msra.gmra.mxu3 %v54_v48 }
  0x29   :  { %627 = vmatpush.bf16.msrb.mxu3 %v935_v6 }
  0x2a   :  { %515 = vmatpush.bf16.msrb.mxu0 %v917_v45 }
  0x2b   :  { %529 = vmatpush.bf16.msrb.mxu1 %v925_v46 }
  0x2d   :  { %628 = vmatpush.bf16.msrb.mxu3 %v934_v7 }
  0x2e   :  { %516 = vmatpush.bf16.msrb.mxu0 %v916_v49 }
  0x2f   :  { %530 = vmatpush.bf16.msrb.mxu1 %v924_v50 }
  0x31   :  { %629 = vmatpush.bf16.msrb.mxu3 %v933_v8 }
  0x32   :  { %517 = vmatpush.bf16.msrb.mxu0 %v915_v51 }
  0x33   :  { %531 = vmatpush.bf16.msrb.mxu1 %v923_v52 }
  0x35   :  { %630 = vmatpush.bf16.msrb.mxu3 %v932_v9 }
  0x36   :  { %518 = vmatpush.bf16.msrb.mxu0 %v914_v53 }
  0x37   :  { %532 = vmatpush.bf16.msrb.mxu1 %v922_v54  ;;  %846 = vmatmul.msk.bf16.vlgmr.msrb.gmra.mxu2 %vm454_vm0, %v57_v59 }
  0x39   :  { %631 = vmatpush.bf16.msrb.mxu3 %v931_v10 }
  0x3a   :  { %519 = vmatpush.bf16.msrb.mxu0 %v913_v57 }
  0x3b   :  { %533 = vmatpush.bf16.msrb.mxu1 %v921_v58 }
  0x3d   :  { %632 = vmatpush.bf16.msrb.mxu3 %v930_v11 }
  0x3e   :  { %520 = vmatpush.bf16.msrb.mxu0 %v912_v60 }
  0x3f   :  { %534 = vmatpush.bf16.msrb.mxu1 %v920_v61 }
  0x41   :  { %633 = vmatpush.bf16.msrb.mxu3 %v929_v12 }
  0x42   :  { %521 = vmatpush.bf16.msrb.mxu0 %v911_v62 }
  0x43   :  { %535 = vmatpush.bf16.msrb.mxu1 %v919_v63 }
  0x45   :  { %522 = vmatmul.bf16.vlgmr.msrb.gmra.mxu0 %v55_v4  ;;  %634 = vmatpush.bf16.msrb.mxu3 %v928_v16 }
  0x46   :  { %536 = vmatmul.bf16.vlgmr.msrb.gmra.mxu1 %v56_v5 }
  0xa2   :  { %v467_v13 = vpop.f32.mrf.mxu0 }
  0xa3   :  { %v481_v14 = vpop.f32.mrf.mxu1  ;;  %v468_v18 = vadd.f32 %v944_v17, %v467_v13 }
  0xa5   :  { %v482_v22 = vadd.f32 %v481_v14, %v468_v18 }
  0xaa   :  { %v495_v15 = vpop.f32.mrf.mxu2  ;;  %v469_v19 = vpop.f32.mrf.mxu0 }
  0xab   :  { %v483_v20 = vpop.f32.mrf.mxu1  ;;  %v509_v23 = vpop.f32.mrf.mxu3  ;;  %v470_v24 = vadd.f32 %v944_v17, %v469_v19  ;;  %v496_v25 = vadd.f32 %v495_v15, %v482_v22 }
  0xad   :  { %v484_v26 = vadd.f32 %v483_v20, %v470_v24  ;;  %v510_v29 = vadd.f32 %v509_v23, %v496_v25 }
  0xb2   :  { %v497_v21 = vpop.f32.mrf.mxu2 }
  0xb3   :  { %v498_v31 = vadd.f32 %v497_v21, %v484_v26  ;;  %v511_v33 = vpop.f32.mrf.mxu3 }
  0xb5   :  { %v512_v34 = vadd.f32 %v511_v33, %v498_v31 }
  0xba   :  { %v551_v30 = vpop.f32.mrf.mxu2 }
  0xc2   :  { %v523_v27 = vpop.f32.mrf.mxu0  ;;  %v553_v41 = vpop.f32.mrf.mxu2 }
  0xc3   :  { %v537_v28 = vpop.f32.mrf.mxu1  ;;  %v524_v32 = vadd.f32 %v523_v27, %v510_v29 }
  0xc5   :  { %v538_v35 = vadd.f32 %v537_v28, %v524_v32 }
  0xc7   :  { %v552_v39 = vadd.f32 %v551_v30, %v538_v35 }
  0xc9   :  { %v556_v43 = vmax.f32 %v552_v39, 0.0 }
  0xca   :  { %v525_v36 = vpop.f32.mrf.mxu0 }
  0xcb   :  { %v526_v37 = vadd.f32 %v525_v36, %v512_v34  ;;  %v539_v38 = vpop.f32.mrf.mxu1 }
  0xcd   :  { %v540_v40 = vadd.f32 %v539_v38, %v526_v37 }
  0xcf   :  { %v554_v42 = vadd.f32 %v553_v41, %v540_v40 }
  0xd1   :  { %v557_v44 = vmax.f32 %v554_v42, 0.0 }
  0xd3   :  { %v558_v45 = vpack.c.bf16 %v557_v44, %v556_v43 }
  0xd5   :  { %635 = vmatmul.bf16.vlgmr.msrb.gmra.mxu3 %v558_v45 }
 0x158   :  { %v636_v46 = vpop.f32.mrf.mxu3 }
 0x159   :  { %v637_v49 = vadd.f32 %v945_v47, %v636_v46 }
 0x160   :  { %v638_v48 = vpop.f32.mrf.mxu3 }
 0x161   :  { %v639_v50 = vadd.f32 %v945_v47, %v638_v48 }
 0x163   :  { %v939_v51 = vpack.c.bf16 %v639_v50, %v637_v49 }
 0x165   :  { %940 = vst [vmem:[%s1088_s5] sm:$0xff] %v939_v51  }
 0x166   :  { %649 = vsyncpa [#allocation3], 1 }

</bundles_post_ra>
